<compile_context>
chip_gen: v5e
topology: v5e:2x2
jax: 0.10.0
libtpu: 0.0.40
codegen_flags: <defaults>
</compile_context>

<pallas_src>
import functools

import jax
import jax.numpy as jnp
from jax.experimental import pallas as pl
from jax.experimental.pallas import tpu as pltpu


# ----------------------------- kernel body -----------------------------------


def _mlp_logsoftmax_kernel(x_ref, w1_ref, b1_ref, w2_ref, b2_ref, out_ref):
    # Exact f32 when streaming f32 (HIGHEST forces full-precision MXU passes);
    # bf16 inputs are already the MXU's native width -> default precision.
    prec = (jax.lax.Precision.HIGHEST
            if x_ref.dtype == jnp.float32 else jax.lax.Precision.DEFAULT)

    # hidden = relu(x @ W1 + b1)   (MXU matmul, f32 accumulation; bias/ReLU in f32)
    h = jnp.dot(x_ref[...], w1_ref[...],
                preferred_element_type=jnp.float32, precision=prec)
    h = jnp.maximum(h + b1_ref[...], 0.0)

    # logits = h @ W2 + b2 (activations cast back to the weight dtype for the MXU)
    logits = jnp.dot(h.astype(w2_ref.dtype), w2_ref[...],
                     preferred_element_type=jnp.float32, precision=prec)
    logits = logits + b2_ref[...]

    # Numerically stable log-softmax along the class axis (strictly row-local).
    m = jnp.max(logits, axis=-1, keepdims=True)
    shifted = logits - m
    lse = jnp.log(jnp.sum(jnp.exp(shifted), axis=-1, keepdims=True))
    out_ref[...] = (shifted - lse).astype(out_ref.dtype)


# ----------------------------- wrapper ----------------------------------------


def _round_up(v, m):
    return ((v + m - 1) // m) * m


def _cdiv(a, b):
    return (a + b - 1) // b


_ROW_MULT = 16   # sublane multiple safe for both f32 (8) and packed bf16 (16) blocks
_TM_CAP = 4096   # batch-tile cap; large tiles amortize the ~0.35 us per-step overhead


def _vmem_capacity_bytes():
    """Per-core VMEM capacity; conservative (v7x, 64 MiB/TC) fallback on failure."""
    try:
        return int(pltpu.get_tpu_info().vmem_capacity_bytes)
    except Exception:
        return 64 << 20


def _choose_batch_tile(n_rows, x_row_bytes, out_row_bytes, h_row_bytes,
                       resident_bytes, vmem_cap):
    """Largest batch tile (multiple of _ROW_MULT, <= _TM_CAP, <= n_rows) whose
    double-buffered x/out streams + hidden scratch fit the per-core VMEM budget."""
    stream_budget = max(8 << 20, (vmem_cap // 2) - resident_bytes)
    per_row = 2 * (x_row_bytes + out_row_bytes) + h_row_bytes
    tm = stream_budget // max(per_row, 1)
    tm = int(max(_ROW_MULT, min(_TM_CAP, (tm // _ROW_MULT) * _ROW_MULT)))
    # Never exceed the array extent (keeps block_shape <= array shape).
    tm = min(tm, max(_ROW_MULT, (n_rows // _ROW_MULT) * _ROW_MULT))
    # Prefer an even number of batch tiles so the "parallel" axis splits evenly
    # across both TensorCores on v7x.
    n_tiles = _cdiv(n_rows, tm)
    if n_tiles > 1 and n_tiles % 2 == 1:
        tm = max(_ROW_MULT, _round_up(_cdiv(n_rows, n_tiles + 1), _ROW_MULT))
    return tm


@functools.partial(jax.jit, static_argnames=("use_bf16",))
def two_layer_mlp_forward(x, w1, b1, w2, b2, use_bf16=True):
    """x: (N, Din); w1: (Din, H); b1: (H,); w2: (H, C); b2: (C,).
    Returns (N, C) float32 log-probabilities."""
    N, Din = x.shape
    H = w1.shape[1]
    C = w2.shape[1]

    in_dtype = jnp.bfloat16 if use_bf16 else jnp.float32
    itemsize = jnp.dtype(in_dtype).itemsize

    # Streamed activations: single dtype cast, no shape padding of x.
    x_in = x.astype(in_dtype)

    # Resident weights: one-time cast; hidden dim zero-padded to a multiple of 128
    # (mathematically inert through ReLU and the second matmul, negligible bytes).
    H_p = _round_up(H, 128)
    if H_p == H:
        w1_p = w1.astype(in_dtype)
        w2_p = w2.astype(in_dtype)
        b1_p = b1.astype(jnp.float32).reshape(1, H)
    else:
        w1_p = jnp.zeros((Din, H_p), in_dtype).at[:, :H].set(w1.astype(in_dtype))
        w2_p = jnp.zeros((H_p, C), in_dtype).at[:H, :].set(w2.astype(in_dtype))
        b1_p = jnp.zeros((1, H_p), jnp.float32).at[0, :H].set(b1.astype(jnp.float32))
    b2_p = b2.astype(jnp.float32).reshape(1, C)

    # Tiny batches only: pad rows up to one sublane group so block_shape never
    # exceeds the array extent. Larger batches are NOT padded — the final partial
    # tile's out-of-bounds rows are garbage that never gets written back.
    N_rows = N
    if N < _ROW_MULT:
        N_rows = _ROW_MULT
        x_in = jnp.zeros((N_rows, Din), in_dtype).at[:N, :].set(x_in)

    # Resident footprint counted at 2x (Pallas double-buffers inputs by default).
    resident = 2 * ((Din * H_p + H_p * C) * itemsize + (H_p + C) * 4)
    vmem_cap = _vmem_capacity_bytes()
    # TODO(synk): for very large hidden dims where `resident` nears ~1/3 of per-core
    # VMEM, tile H with a second ("arbitrary") grid axis + f32 VMEM accumulator
    # instead of keeping W1/W2 fully resident.
    TM = _choose_batch_tile(
        N_rows,
        x_row_bytes=Din * itemsize,
        out_row_bytes=C * 4,
        h_row_bytes=H_p * 4,
        resident_bytes=resident,
        vmem_cap=vmem_cap,
    )
    grid = (_cdiv(N_rows, TM),)

    streaming = 2 * TM * (Din * itemsize + C * 4)          # double-buffered x / out tiles
    scratch = 4 * TM * (2 * H_p + 4 * C)                   # hidden + softmax temporaries
    vmem_limit = resident + streaming + scratch + (4 << 20)
    vmem_limit = int(max(8 << 20, min(vmem_limit, vmem_cap - (2 << 20), 100 << 20)))

    cost = pl.CostEstimate(
        flops=2 * N * (Din * H + H * C),
        transcendentals=N * (C + 1),                        # exp per class + log per row
        bytes_accessed=(N * Din * itemsize + (Din * H + H * C) * itemsize
                        + (H + C) * 4 + N * C * 4),
    )

    out = pl.pallas_call(
        _mlp_logsoftmax_kernel,
        out_shape=jax.ShapeDtypeStruct((N_rows, C), jnp.float32),
        grid=grid,
        in_specs=[
            pl.BlockSpec((TM, Din), lambda i: (i, 0)),     # x: streamed per batch tile
            pl.BlockSpec((Din, H_p), lambda i: (0, 0)),    # W1: VMEM-resident
            pl.BlockSpec((1, H_p), lambda i: (0, 0)),      # b1: VMEM-resident
            pl.BlockSpec((H_p, C), lambda i: (0, 0)),      # W2: VMEM-resident
            pl.BlockSpec((1, C), lambda i: (0, 0)),        # b2: VMEM-resident
        ],
        out_specs=pl.BlockSpec((TM, C), lambda i: (i, 0)), # narrow store: no padded columns
        compiler_params=pltpu.CompilerParams(
            dimension_semantics=("parallel",),
            vmem_limit_bytes=vmem_limit,
        ),
        cost_estimate=cost,
    )(x_in, w1_p, b1_p, w2_p, b2_p)

    return out[:N] if N_rows != N else out


# ----------------------------- reference & demo --------------------------------


def _reference_forward(x, w1, b1, w2, b2):
    hi = jax.lax.Precision.HIGHEST
    h = jnp.maximum(jnp.dot(x, w1, precision=hi) + b1, 0.0)
    logits = jnp.dot(h, w2, precision=hi) + b2
    return jax.nn.log_softmax(logits, axis=1)


if __name__ == "__main__":
    # Small shapes consistent with the module: batch=8, input_dim=4, hidden=32, C=2.
    N, input_dim, hidden_dim, C = 8, 4, 32, 2

    key = jax.random.PRNGKey(0)
    kx, kw1, kb1, kw2, kb2 = jax.random.split(key, 5)

    x = jax.random.normal(kx, (N, input_dim), dtype=jnp.float32)

    # Deterministic parameter init (PyTorch-Linear-style uniform bounds).
    bound1 = 1.0 / (input_dim ** 0.5)
    w1 = jax.random.uniform(kw1, (input_dim, hidden_dim), jnp.float32, -bound1, bound1)
    b1 = jax.random.uniform(kb1, (hidden_dim,), jnp.float32, -bound1, bound1)
    bound2 = 1.0 / (hidden_dim ** 0.5)
    w2 = jax.random.uniform(kw2, (hidden_dim, C), jnp.float32, -bound2, bound2)
    b2 = jax.random.uniform(kb2, (C,), jnp.float32, -bound2, bound2)

    ref = _reference_forward(x, w1, b1, w2, b2)

    # Exact-f32 path (tight tolerance).
    out_f32 = jax.block_until_ready(two_layer_mlp_forward(x, w1, b1, w2, b2, use_bf16=False))
    assert out_f32.shape == (N, C), f"bad output shape {out_f32.shape}"
    assert jnp.allclose(out_f32, ref, atol=1e-5, rtol=1e-5), "f32 Pallas output mismatch"

    # Default bf16-streaming path (bf16-input-level tolerance vs f32 reference).
    out_bf16 = jax.block_until_ready(two_layer_mlp_forward(x, w1, b1, w2, b2))
    assert out_bf16.shape == (N, C), f"bad output shape {out_bf16.shape}"
    assert jnp.allclose(out_bf16, ref, atol=1e-1, rtol=5e-2), "bf16 Pallas output mismatch"

    print("KERNEL_OK")
</pallas_src>

<mosaic_0001>
module attributes {stable_mosaic.version = 11 : i64} {
  func.func @_mlp_logsoftmax_kernel(%arg0: i32, %arg1: memref<16x4xf32, #tpu.memory_space<vmem>>, %arg2: memref<4x128xf32, #tpu.memory_space<vmem>>, %arg3: memref<1x128xf32, #tpu.memory_space<vmem>>, %arg4: memref<128x2xf32, #tpu.memory_space<vmem>>, %arg5: memref<1x2xf32, #tpu.memory_space<vmem>>, %arg6: memref<16x2xf32, #tpu.memory_space<vmem>>) attributes {dimension_semantics = [#tpu.dimension_semantics<parallel>], iteration_bounds = array<i64: 1>, scalar_prefetch = 0 : i64, scratch_operands = 0 : i64, tpu.core_type = #tpu.core_type<tc>, window_params = [{transform_indices = @transform_0, window_bounds = array<i64: 16, 4>}, {pipeline_mode = #tpu.pipeline_mode<synchronous>, transform_indices = @transform_1, window_bounds = array<i64: 4, 128>}, {pipeline_mode = #tpu.pipeline_mode<synchronous>, transform_indices = @transform_2, window_bounds = array<i64: 1, 128>}, {pipeline_mode = #tpu.pipeline_mode<synchronous>, transform_indices = @transform_3, window_bounds = array<i64: 128, 2>}, {pipeline_mode = #tpu.pipeline_mode<synchronous>, transform_indices = @transform_4, window_bounds = array<i64: 1, 2>}, {transform_indices = @transform_5, window_bounds = array<i64: 16, 2>}]} {
    %c0 = arith.constant 0 : index
    %c0_0 = arith.constant 0 : index
    %0 = vector.load %arg1[%c0, %c0_0] : memref<16x4xf32, #tpu.memory_space<vmem>>, vector<16x4xf32>
    %c0_1 = arith.constant 0 : index
    %c0_2 = arith.constant 0 : index
    %1 = vector.load %arg2[%c0_1, %c0_2] : memref<4x128xf32, #tpu.memory_space<vmem>>, vector<4x128xf32>
    %cst = arith.constant dense<0.000000e+00> : vector<16x128xf32>
    %2 = tpu.matmul %0, %1, %cst {dimension_numbers = #tpu.dot_dimension_numbers<[1], [0], [0], [1], [0, 0, 1, 1], [], []>, precision = #tpu.contract_precision<fp32>} : vector<16x4xf32>, vector<4x128xf32>, vector<16x128xf32> -> vector<16x128xf32>
    %c0_3 = arith.constant 0 : index
    %c0_4 = arith.constant 0 : index
    %3 = vector.load %arg3[%c0_3, %c0_4] : memref<1x128xf32, #tpu.memory_space<vmem>>, vector<1x128xf32>
    %4 = vector.broadcast %3 : vector<1x128xf32> to vector<16x128xf32>
    %5 = arith.addf %2, %4 : vector<16x128xf32>
    %cst_5 = arith.constant 0.000000e+00 : f32
    %6 = vector.broadcast %cst_5 : f32 to vector<16x128xf32>
    %7 = arith.maximumf %5, %6 : vector<16x128xf32>
    %c0_6 = arith.constant 0 : index
    %c0_7 = arith.constant 0 : index
    %8 = vector.load %arg4[%c0_6, %c0_7] : memref<128x2xf32, #tpu.memory_space<vmem>>, vector<128x2xf32>
    %cst_8 = arith.constant dense<0.000000e+00> : vector<16x2xf32>
    %9 = tpu.matmul %7, %8, %cst_8 {dimension_numbers = #tpu.dot_dimension_numbers<[1], [0], [0], [1], [0, 0, 1, 1], [], []>, precision = #tpu.contract_precision<fp32>} : vector<16x128xf32>, vector<128x2xf32>, vector<16x2xf32> -> vector<16x2xf32>
    %c0_9 = arith.constant 0 : index
    %c0_10 = arith.constant 0 : index
    %10 = vector.load %arg5[%c0_9, %c0_10] : memref<1x2xf32, #tpu.memory_space<vmem>>, vector<1x2xf32>
    %11 = vector.broadcast %10 : vector<1x2xf32> to vector<16x2xf32>
    %12 = arith.addf %9, %11 : vector<16x2xf32>
    %cst_11 = arith.constant dense<0xFF800000> : vector<16xf32>
    %13 = vector.multi_reduction <maximumf>, %12, %cst_11 [1] : vector<16x2xf32> to vector<16xf32>
    %14 = vector.shape_cast %13 : vector<16xf32> to vector<16x1xf32>
    %15 = vector.broadcast %14 : vector<16x1xf32> to vector<16x2xf32>
    %16 = arith.subf %12, %15 : vector<16x2xf32>
    %17 = math.exp %16 : vector<16x2xf32>
    %cst_12 = arith.constant dense<0.000000e+00> : vector<16xf32>
    %18 = vector.multi_reduction <add>, %17, %cst_12 [1] : vector<16x2xf32> to vector<16xf32>
    %19 = vector.shape_cast %18 : vector<16xf32> to vector<16x1xf32>
    %20 = math.log %19 : vector<16x1xf32>
    %21 = vector.broadcast %20 : vector<16x1xf32> to vector<16x2xf32>
    %22 = arith.subf %16, %21 : vector<16x2xf32>
    %c0_13 = arith.constant 0 : index
    %c0_14 = arith.constant 0 : index
    %23 = vector.load %arg6[%c0_13, %c0_14] : memref<16x2xf32, #tpu.memory_space<vmem>>, vector<16x2xf32>
    tpu.vector_store %arg6[%c0_13, %c0_14], %22 {strides = array<i32>} : memref<16x2xf32, #tpu.memory_space<vmem>>, vector<16x2xf32>,
    return
  }
  func.func @transform_0(%arg0: i32) -> (i32, i32) {
    %c0_i32 = arith.constant 0 : i32
    %c0_i32_0 = arith.constant 0 : i32
    return %arg0, %c0_i32 : i32, i32
  }
  func.func @transform_1(%arg0: i32) -> (i32, i32) {
    %c0_i32 = arith.constant 0 : i32
    %c0_i32_0 = arith.constant 0 : i32
    %c0_i32_1 = arith.constant 0 : i32
    return %c0_i32, %c0_i32_0 : i32, i32
  }
  func.func @transform_2(%arg0: i32) -> (i32, i32) {
    %c0_i32 = arith.constant 0 : i32
    %c0_i32_0 = arith.constant 0 : i32
    %c0_i32_1 = arith.constant 0 : i32
    return %c0_i32, %c0_i32_0 : i32, i32
  }
  func.func @transform_3(%arg0: i32) -> (i32, i32) {
    %c0_i32 = arith.constant 0 : i32
    %c0_i32_0 = arith.constant 0 : i32
    %c0_i32_1 = arith.constant 0 : i32
    return %c0_i32, %c0_i32_0 : i32, i32
  }
  func.func @transform_4(%arg0: i32) -> (i32, i32) {
    %c0_i32 = arith.constant 0 : i32
    %c0_i32_0 = arith.constant 0 : i32
    %c0_i32_1 = arith.constant 0 : i32
    return %c0_i32, %c0_i32_0 : i32, i32
  }
  func.func @transform_5(%arg0: i32) -> (i32, i32) {
    %c0_i32 = arith.constant 0 : i32
    %c0_i32_0 = arith.constant 0 : i32
    return %arg0, %c0_i32 : i32, i32
  }
}

</mosaic_0001>

<bundles_post_ra>
// kernel: two_layer_mlp_forward.1
= control target key start
LH: loop header
LB: loop body
LE: loop exit
PB: predicated region body
PF: predicated region fallthrough
CT: control target
= control target key end

     0   :  { %vm34_vm0 = vcmask 1043456   ;;  %vm27_vm1 = vcmask 31744   ;;  %vm609_vm2 = vcmask 15360   ;;  %s961_s1 = inlined_call_operand.vmem [shape: f32[4,128], index: 1, kind: input, shape index: {}]   ;;  %s962_s0 = inlined_call_operand.vmem [shape: f32[16,4], index: 0, kind: input, shape index: {}]   ;;  %s963_s2 = inlined_call_operand.vmem [shape: f32[1,128], index: 2, kind: input, shape index: {}]   ;;  %s964_s3 = inlined_call_operand.vmem [shape: f32[128,2], index: 3, kind: input, shape index: {}]   ;;  %s965_s4 = inlined_call_operand.vmem [shape: f32[1,2], index: 4, kind: input, shape index: {}]   ;;  %s966_s5 = inlined_call_operand.vmem [shape: f32[16,2], index: 5, kind: output, shape index: {}]  }
   0x1   :  { %v22_v0 = vld [vmem:[%s961_s1] sm:$0xf]  ;;  %v21_v2 = vld [vmem:[%s962_s0 + $0x8] sm:$0xff]  ;;  %v232_v12 = vld [vmem:[%s964_s3 + $0x78] sm:$0xff] }
   0x2   :  { %v20_v1 = vld [vmem:[%s962_s0] sm:$0xff]  ;;  %v36_v3 = vsel %vm34_vm0, %v22_v0, 0  ;;  %v32_v5 = vsel %vm27_vm1, %v21_v2, 0  ;;  %v231_v13 = vld [vmem:[%s964_s3 + $0x70] sm:$0xff]  ;;  %v230_v14 = vld [vmem:[%s964_s3 + $0x68] sm:$0xff]  ;;  %v704_v18 = vand.u32 4294901760, %v232_v12 }
   0x3   :  { %v29_v4 = vsel %vm27_vm1, %v20_v1, 0  ;;  %v53_v6 = vand.u32 4294901760, %v36_v3  ;;  %v691_v8 = vand.u32 4294901760, %v32_v5  ;;  %v229_v19 = vld [vmem:[%s964_s3 + $0x60] sm:$0xff]  ;;  %v228_v20 = vld [vmem:[%s964_s3 + $0x58] sm:$0xff]  ;;  %v712_v21 = vand.u32 4294901760, %v231_v13 }
   0x4   :  { %v689_v7 = vand.u32 4294901760, %v29_v4  ;;  %v714_v22 = vand.u32 4294901760, %v230_v14  ;;  %v716_v23 = vand.u32 4294901760, %v229_v19  ;;  %v718_v24 = vand.u32 4294901760, %v228_v20  ;;  %v227_v25 = vld [vmem:[%s964_s3 + $0x50] sm:$0xff]  ;;  %v226_v33 = vld [vmem:[%s964_s3 + $0x48] sm:$0xff] }
   0x5   :  { %v88_v9 = vsub.f32 %v36_v3, %v53_v6  ;;  %54 = vmatpush.msra.mxu0 %v53_v6  ;;  %147 = vmatpush.msra.mxu3 %v53_v6  ;;  %v64_v11 = vsub.f32 %v32_v5, %v691_v8  ;;  %v723_v28 = vand.u32 4294901760, %v227_v25  ;;  %v726_v29 = vsub.f32 %v232_v12, %v704_v18  ;;  %v225_v34 = vld [vmem:[%s964_s3 + $0x40] sm:$0xff]  ;;  %v224_v52 = vld [vmem:[%s964_s3 + $0x38] sm:$0xff]  ;;  %v223_v53 = vld [vmem:[%s964_s3 + $0x30] sm:$0xff] }
   0x6   :  { %v56_v10 = vsub.f32 %v29_v4, %v689_v7  ;;  %v729_v30 = vsub.f32 %v231_v13, %v712_v21  ;;  %v732_v31 = vsub.f32 %v230_v14, %v714_v22  ;;  %v735_v32 = vsub.f32 %v229_v19, %v716_v23  ;;  %v222_v54 = vld [vmem:[%s964_s3 + $0x28] sm:$0xff] }
   0x7   :  { %119 = vmatpush.msra.mxu2 %v88_v9  ;;  %v89_v16 = vand.u32 4294901760, %v88_v9  ;;  %v65_v17 = vand.u32 4294901760, %v64_v11  ;;  %v745_v38 = vsub.f32 %v228_v20, %v718_v24  ;;  %v288_v39 = vand.u32 4294901760, %v726_v29 }
   0x8   :  { %v57_v15 = vand.u32 4294901760, %v56_v10  ;;  %122 = vmatmul.f32.vlgmr.msra.gmra.mxu2 %v56_v10  ;;  %v294_v40 = vand.u32 4294901760, %v729_v30  ;;  %v300_v41 = vand.u32 4294901760, %v732_v31  ;;  %v306_v42 = vand.u32 4294901760, %v735_v32 }
   0x9   :  { %179 = vmatpush.msrb.mxu0 %v89_v16  ;;  %v90_v27 = vsub.f32 %v88_v9, %v89_v16  ;;  %238 = vmatpush.msrb.mxu2 %v704_v18  ;;  %v66_v37 = vsub.f32 %v64_v11, %v65_v17  ;;  %v312_v43 = vand.u32 4294901760, %v745_v38  ;;  %v754_v44 = vsub.f32 %v227_v25, %v723_v28 }
   0xa   :  { %v58_v26 = vsub.f32 %v56_v10, %v57_v15  ;;  %151 = vmatmul.f32.vlgmr.msra.gmra.mxu3 %v57_v15  ;;  %v756_v45 = vand.u32 4294901760, %v226_v33  ;;  %v758_v46 = vand.u32 4294901760, %v225_v34  ;;  %v289_v47 = vsub.f32 %v726_v29, %v288_v39 }
   0xb   :  { %v91_v36 = vand.u32 4294901760, %v90_v27  ;;  %240 = vmatpush.msrb.mxu2 %v712_v21  ;;  %v295_v48 = vsub.f32 %v729_v30, %v294_v40  ;;  %v301_v49 = vsub.f32 %v732_v31, %v300_v41  ;;  %v307_v50 = vsub.f32 %v735_v32, %v306_v42 }
   0xc   :  { %v59_v35 = vand.u32 4294901760, %v58_v26  ;;  %v775_v51 = vsub.f32 %v226_v33, %v756_v45  ;;  %v290_v55 = vand.u32 4294901760, %v289_v47  ;;  %v318_v57 = vand.u32 4294901760, %v754_v44  ;;  %v219_v47 = vld [vmem:[%s964_s3 + $0x10] sm:$0xff] }
   0xd   :  { %92 = vmatpush.msra.mxu1 %v91_v36  ;;  %242 = vmatpush.msrb.mxu2 %v714_v22  ;;  %v296_v56 = vand.u32 4294901760, %v295_v48  ;;  %v788_v58 = vsub.f32 %v225_v34, %v758_v46  ;;  %v67_v59 = vand.u32 4294901760, %v66_v37  ;;  %v302_v60 = vand.u32 4294901760, %v301_v49 }
   0xe   :  { %60 = vmatmul.f32.vlgmr.msra.gmra.mxu0 %v59_v35  ;;  %94 = vmatmul.f32.vlgmr.msra.gmra.mxu1 %v689_v7  ;;  %v313_v61 = vsub.f32 %v745_v38, %v312_v43  ;;  %v324_v62 = vand.u32 4294901760, %v775_v51  ;;  %v796_v63 = vand.u32 4294901760, %v224_v52  ;;  %v798_v0 = vand.u32 4294901760, %v223_v53 }
   0xf   :  { %205 = vmatpush.msrb.mxu1 %v53_v6  ;;  %393 = vmatpush.msra.mxu0 %v726_v29  ;;  %v801_v1 = vand.u32 4294901760, %v222_v54  ;;  %v308_v2 = vand.u32 4294901760, %v307_v50  ;;  %v319_v3 = vsub.f32 %v754_v44, %v318_v57  ;;  %v330_v4 = vand.u32 4294901760, %v788_v58 }
  0x10   :  { %127 = vmatmul.f32.gmra.mxu2 %v64_v11  ;;  %291 = vmatpush.msrb.mxu3 %v290_v55  ;;  %v810_v5 = vsub.f32 %v224_v52, %v796_v63  ;;  %v813_v6 = vsub.f32 %v223_v53, %v798_v0  ;;  %v314_v9 = vand.u32 4294901760, %v313_v61  ;;  %v325_v10 = vsub.f32 %v775_v51, %v324_v62  ;;  %v218_v52 = vld [vmem:[%s964_s3 + $0x8] sm:$0xff] }
  0x11   :  { %244 = vmatpush.msrb.mxu2 %v716_v23  ;;  %396 = vmatpush.msra.mxu0 %v729_v30  ;;  %v823_v12 = vsub.f32 %v222_v54, %v801_v1  ;;  %v320_v13 = vand.u32 4294901760, %v319_v3  ;;  %v331_v14 = vsub.f32 %v788_v58, %v330_v4  ;;  %v886_v50 = vand.u32 4294901760, %v219_v47 }
  0x12   :  { %157 = vmatmul.f32.gmra.mxu3 %v65_v17  ;;  %451 = vmatpush.msra.mxu1 %v704_v18  ;;  %v336_v11 = vand.u32 4294901760, %v810_v5  ;;  %v342_v15 = vand.u32 4294901760, %v813_v6  ;;  %v326_v16 = vand.u32 4294901760, %v325_v10 }
  0x13   :  { %246 = vmatpush.msrb.mxu2 %v718_v24  ;;  %297 = vmatpush.msrb.mxu3 %v296_v56  ;;  %v348_v19 = vand.u32 4294901760, %v823_v12  ;;  %v332_v20 = vand.u32 4294901760, %v331_v14  ;;  %v365_v55 = vsub.f32 %v219_v47, %v886_v50  ;;  %v896_v56 = vand.u32 4294901760, %v218_v52 }
  0x14   :  { %399 = vmatpush.msra.mxu0 %v732_v31  ;;  %453 = vmatpush.msra.mxu1 %v712_v21  ;;  %v337_v17 = vsub.f32 %v810_v5, %v336_v11  ;;  %v343_v25 = vsub.f32 %v813_v6, %v342_v15 }
  0x15   :  { %248 = vmatpush.msrb.mxu2 %v723_v28  ;;  %303 = vmatpush.msrb.mxu3 %v302_v60  ;;  %v349_v27 = vsub.f32 %v823_v12, %v348_v19  ;;  %v371_v3 = vsub.f32 %v218_v52, %v896_v56 }
  0x16   :  { %68 = vmatmul.f32.gmra.mxu0 %v67_v59  ;;  %98 = vmatmul.f32.gmra.mxu1 %v691_v8  ;;  %v338_v26 = vand.u32 4294901760, %v337_v17  ;;  %v344_v33 = vand.u32 4294901760, %v343_v25  ;;  %v217_v59 = vld [vmem:[%s964_s3] sm:$0xff] }
  0x17   :  { %250 = vmatpush.msrb.mxu2 %v756_v45  ;;  %309 = vmatpush.msrb.mxu3 %v308_v2  ;;  %v350_v34 = vand.u32 4294901760, %v349_v27  ;;  %v366_v2 = vand.u32 4294901760, %v365_v55  ;;  %v372_v14 = vand.u32 4294901760, %v371_v3 }
  0x18   :  { %402 = vmatpush.msra.mxu0 %v735_v32  ;;  %455 = vmatpush.msra.mxu1 %v714_v22 }
  0x19   :  { %252 = vmatpush.msrb.mxu2 %v758_v46  ;;  %315 = vmatpush.msrb.mxu3 %v314_v9  ;;  %v267_v9 = vand.u32 4294901760, %v217_v59 }
  0x1a   :  { %405 = vmatpush.msra.mxu0 %v745_v38  ;;  %457 = vmatpush.msra.mxu1 %v716_v23 }
  0x1b   :  { %254 = vmatpush.msrb.mxu2 %v796_v63  ;;  %321 = vmatpush.msrb.mxu3 %v320_v13  ;;  %v367_v13 = vsub.f32 %v365_v55, %v366_v2 }
  0x1c   :  { %408 = vmatpush.msra.mxu0 %v754_v44  ;;  %459 = vmatpush.msra.mxu1 %v718_v24 }
  0x1d   :  { %256 = vmatpush.msrb.mxu2 %v798_v0  ;;  %327 = vmatpush.msrb.mxu3 %v326_v16  ;;  %v377_v16 = vsub.f32 %v217_v59, %v267_v9  ;;  %v368_v17 = vand.u32 4294901760, %v367_v13 }
  0x1e   :  { %181 = vmatmul.f32.vlgmr.msrb.gmra.mxu0 %v689_v7  ;;  %207 = vmatmul.f32.vlgmr.msrb.gmra.mxu1 %v689_v7  ;;  %v221_v7 = vld [vmem:[%s964_s3 + $0x20] sm:$0xff] }
  0x1f   :  { %258 = vmatpush.msrb.mxu2 %v801_v1  ;;  %333 = vmatpush.msrb.mxu3 %v332_v20  ;;  %v869_v35 = vand.u32 4294901760, %v221_v7  ;;  %v373_v20 = vsub.f32 %v371_v3, %v372_v14  ;;  %v378_v25 = vand.u32 4294901760, %v377_v16 }
  0x20   :  { %411 = vmatpush.msra.mxu0 %v775_v51  ;;  %461 = vmatpush.msra.mxu1 %v723_v28 }
  0x21   :  { %339 = vmatpush.msrb.mxu3 %v338_v26  ;;  %v875_v36 = vsub.f32 %v221_v7, %v869_v35  ;;  %260 = vmatpush.msrb.mxu2 %v869_v35  ;;  %v374_v26 = vand.u32 4294901760, %v373_v20  ;;  %v379_v27 = vsub.f32 %v377_v16, %v378_v25 }
  0x22   :  { %414 = vmatpush.msra.mxu0 %v788_v58  ;;  %463 = vmatpush.msra.mxu1 %v756_v45 }
  0x23   :  { %345 = vmatpush.msrb.mxu3 %v344_v33  ;;  %v354_v48 = vand.u32 4294901760, %v875_v36  ;;  %v380_v33 = vand.u32 4294901760, %v379_v27 }
  0x24   :  { %417 = vmatpush.msra.mxu0 %v810_v5  ;;  %465 = vmatpush.msra.mxu1 %v758_v46 }
  0x25   :  { %351 = vmatpush.msrb.mxu3 %v350_v34  ;;  %v355_v53 = vsub.f32 %v875_v36, %v354_v48 }
  0x26   :  { %185 = vmatmul.f32.gmra.mxu0 %v691_v8  ;;  %211 = vmatmul.f32.gmra.mxu1 %v691_v8  ;;  %v220_v8 = vld [vmem:[%s964_s3 + $0x18] sm:$0xff] }
  0x27   :  { %420 = vmatpush.msra.mxu0 %v813_v6  ;;  %467 = vmatpush.msra.mxu1 %v796_v63  ;;  %v877_v37 = vand.u32 4294901760, %v220_v8  ;;  %v356_v60 = vand.u32 4294901760, %v355_v53 }
  0x29   :  { %423 = vmatpush.msra.mxu0 %v823_v12  ;;  %469 = vmatpush.msra.mxu1 %v798_v0  ;;  %v359_v49 = vsub.f32 %v220_v8, %v877_v37 }
  0x2a   :  { %262 = vmatpush.msrb.mxu2 %v877_v37  ;;  %357 = vmatpush.msrb.mxu3 %v356_v60 }
  0x2b   :  { %471 = vmatpush.msra.mxu1 %v801_v1  ;;  %426 = vmatpush.msra.mxu0 %v875_v36  ;;  %v360_v54 = vand.u32 4294901760, %v359_v49 }
  0x2c   :  { %264 = vmatpush.msrb.mxu2 %v886_v50 }
  0x2d   :  { %473 = vmatpush.msra.mxu1 %v869_v35  ;;  %429 = vmatpush.msra.mxu0 %v359_v49  ;;  %v361_v61 = vsub.f32 %v359_v49, %v360_v54 }
  0x2e   :  { %266 = vmatpush.msrb.mxu2 %v896_v56 }
  0x2f   :  { %475 = vmatpush.msra.mxu1 %v877_v37  ;;  %432 = vmatpush.msra.mxu0 %v365_v55  ;;  %v362_v10 = vand.u32 4294901760, %v361_v61 }
  0x30   :  { %268 = vmatpush.msrb.mxu2 %v267_v9 }
  0x31   :  { %477 = vmatpush.msra.mxu1 %v886_v50  ;;  %435 = vmatpush.msra.mxu0 %v371_v3 }
  0x32   :  { %363 = vmatpush.msrb.mxu3 %v362_v10  ;;  %498 = vmatpush.msra.mxu2 %v288_v39 }
  0x33   :  { %479 = vmatpush.msra.mxu1 %v896_v56  ;;  %438 = vmatpush.msra.mxu0 %v377_v16 }
  0x34   :  { %369 = vmatpush.msrb.mxu3 %v368_v17  ;;  %502 = vmatpush.msra.mxu2 %v294_v40 }
  0x35   :  { %481 = vmatpush.msra.mxu1 %v267_v9 }
  0x36   :  { %375 = vmatpush.msrb.mxu3 %v374_v26  ;;  %506 = vmatpush.msra.mxu2 %v300_v41 }
  0x38   :  { %510 = vmatpush.msra.mxu2 %v306_v42  ;;  %381 = vmatpush.msrb.mxu3 %v380_v33 }
  0x3a   :  { %569 = vmatpush.msra.mxu3 %v704_v18  ;;  %514 = vmatpush.msra.mxu2 %v312_v43  ;;  %v640_v18 = vld [vmem:[%s963_s2] ss:$0 sm:$0xff] }
  0x3c   :  { %571 = vmatpush.msra.mxu3 %v712_v21  ;;  %518 = vmatpush.msra.mxu2 %v318_v57 }
  0x3e   :  { %573 = vmatpush.msra.mxu3 %v714_v22  ;;  %522 = vmatpush.msra.mxu2 %v324_v62 }
  0x40   :  { %575 = vmatpush.msra.mxu3 %v716_v23  ;;  %526 = vmatpush.msra.mxu2 %v330_v4 }
  0x42   :  { %577 = vmatpush.msra.mxu3 %v718_v24  ;;  %530 = vmatpush.msra.mxu2 %v336_v11 }
  0x44   :  { %579 = vmatpush.msra.mxu3 %v723_v28  ;;  %534 = vmatpush.msra.mxu2 %v342_v15 }
  0x46   :  { %581 = vmatpush.msra.mxu3 %v756_v45  ;;  %538 = vmatpush.msra.mxu2 %v348_v19 }
  0x48   :  { %583 = vmatpush.msra.mxu3 %v758_v46  ;;  %542 = vmatpush.msra.mxu2 %v354_v48 }
  0x4a   :  { %585 = vmatpush.msra.mxu3 %v796_v63  ;;  %546 = vmatpush.msra.mxu2 %v360_v54 }
  0x4c   :  { %587 = vmatpush.msra.mxu3 %v798_v0  ;;  %550 = vmatpush.msra.mxu2 %v366_v2 }
  0x4e   :  { %589 = vmatpush.msra.mxu3 %v801_v1  ;;  %554 = vmatpush.msra.mxu2 %v372_v14 }
  0x50   :  { %591 = vmatpush.msra.mxu3 %v869_v35  ;;  %558 = vmatpush.msra.mxu2 %v378_v25 }
  0x52   :  { %593 = vmatpush.msra.mxu3 %v877_v37  ;;  %v641_v37 = vld [vmem:[%s965_s4] ss:$0 sm:$0xff] }
  0x54   :  { %595 = vmatpush.msra.mxu3 %v886_v50 }
  0x56   :  { %597 = vmatpush.msra.mxu3 %v896_v56 }
  0x58   :  { %599 = vmatpush.msra.mxu3 %v267_v9 }
  0x8b   :  { %v61_v21 = vpop.f32.mrf.mxu0  ;;  %v95_v22 = vpop.f32.mrf.mxu1 }
  0x8c   :  { %v62_v23 = vadd.f32 %v640_v18, %v61_v21  ;;  %v123_v24 = vpop.f32.mrf.mxu2 }
  0x8d   :  { %v152_v31 = vpop.f32.mrf.mxu3 }
  0x8e   :  { %v96_v28 = vadd.f32 %v95_v22, %v62_v23 }
  0x90   :  { %v124_v32 = vadd.f32 %v123_v24, %v96_v28 }
  0x92   :  { %v153_v39 = vadd.f32 %v152_v31, %v124_v32 }
  0x93   :  { %v69_v29 = vpop.f32.mrf.mxu0  ;;  %v99_v30 = vpop.f32.mrf.mxu1 }
  0x94   :  { %v70_v38 = vadd.f32 %v640_v18, %v69_v29  ;;  %v128_v41 = vpop.f32.mrf.mxu2 }
  0x95   :  { %v158_v51 = vpop.f32.mrf.mxu3 }
  0x96   :  { %v100_v40 = vadd.f32 %v99_v30, %v70_v38 }
  0x98   :  { %v129_v45 = vadd.f32 %v128_v41, %v100_v40 }
  0x9a   :  { %v159_v58 = vadd.f32 %v158_v51, %v129_v45 }
  0x9b   :  { %v182_v42 = vpop.f32.mrf.mxu0  ;;  %v208_v44 = vpop.f32.mrf.mxu1 }
  0x9c   :  { %v183_v43 = vadd.f32 %v182_v42, %v153_v39 }
  0x9e   :  { %v209_v46 = vadd.f32 %v208_v44, %v183_v43 }
  0xa0   :  { %v215_v57 = vmax.f32 %v209_v46, 0.0 }
  0xa2   :  { %v269_v62 = vand.u32 4294901760, %v215_v57 }
  0xa3   :  { %v186_v63 = vpop.f32.mrf.mxu0  ;;  %v212_v4 = vpop.f32.mrf.mxu1 }
  0xa4   :  { %v270_v0 = vsub.f32 %v215_v57, %v269_v62  ;;  %v187_v1 = vadd.f32 %v186_v63, %v159_v58  ;;  %383 = vmatmul.f32.vlgmr.msrb.gmra.mxu3 %v269_v62 }
  0xa6   :  { %v213_v5 = vadd.f32 %v212_v4, %v187_v1  ;;  %441 = vmatmul.f32.vlgmr.msra.gmra.mxu0 %v270_v0  ;;  %v271_v6 = vand.u32 4294901760, %v270_v0 }
  0xa8   :  { %v216_v11 = vmax.f32 %v213_v5, 0.0  ;;  %485 = vmatmul.f32.vlgmr.msra.gmra.mxu1 %v271_v6  ;;  %v272_v12 = vsub.f32 %v270_v0, %v271_v6 }
  0xaa   :  { %v277_v15 = vand.u32 4294901760, %v216_v11  ;;  %v273_v19 = vand.u32 4294901760, %v272_v12 }
  0xac   :  { %v278_v34 = vsub.f32 %v216_v11, %v277_v15  ;;  %274 = vmatmul.f32.vlgmr.msrb.gmra.mxu2 %v273_v19  ;;  %387 = vmatmul.f32.gmra.mxu3 %v277_v15 }
  0xae   :  { %446 = vmatmul.f32.gmra.mxu0 %v278_v34  ;;  %v279_v7 = vand.u32 4294901760, %v278_v34 }
  0xb0   :  { %491 = vmatmul.f32.gmra.mxu1 %v279_v7  ;;  %v280_v35 = vsub.f32 %v278_v34, %v279_v7 }
  0xb2   :  { %v281_v8 = vand.u32 4294901760, %v280_v35 }
  0xb4   :  { %282 = vmatmul.f32.gmra.mxu2 %v281_v8  ;;  %601 = vmatmul.f32.vlgmr.msra.gmra.mxu3 %v269_v62 }
  0xbc   :  { %560 = vmatmul.f32.vlgmr.msra.gmra.mxu2 %v269_v62  ;;  %605 = vmatmul.f32.gmra.mxu3 %v277_v15 }
  0xc4   :  { %564 = vmatmul.f32.gmra.mxu2 %v277_v15 }
 0x123   :  { %v442_v52 = vpop.f32.mrf.mxu0 }
 0x125   :  { %v486_v56 = vpop.f32.mrf.mxu1 }
 0x127   :  { %v384_v36 = vpop.f32.mrf.mxu3 }
 0x12b   :  { %v447_v9 = vpop.f32.mrf.mxu0 }
 0x12d   :  { %v492_v16 = vpop.f32.mrf.mxu1 }
 0x12f   :  { %v275_v47 = vpop.f32.mrf.mxu2  ;;  %v388_v49 = vpop.f32.mrf.mxu3 }
 0x130   :  { %v276_v48 = vadd.f32 %v641_v37, %v275_v47 }
 0x132   :  { %v385_v50 = vadd.f32 %v384_v36, %v276_v48 }
 0x134   :  { %v443_v55 = vadd.f32 %v442_v52, %v385_v50 }
 0x136   :  { %v487_v60 = vadd.f32 %v486_v56, %v443_v55 }
 0x137   :  { %v283_v53 = vpop.f32.mrf.mxu2  ;;  %v602_v61 = vpop.f32.mrf.mxu3 }
 0x138   :  { %v284_v54 = vadd.f32 %v641_v37, %v283_v53 }
 0x13a   :  { %v389_v59 = vadd.f32 %v388_v49, %v284_v54 }
 0x13c   :  { %v448_v13 = vadd.f32 %v447_v9, %v389_v59 }
 0x13e   :  { %v493_v17 = vadd.f32 %v492_v16, %v448_v13 }
 0x13f   :  { %v561_v2 = vpop.f32.mrf.mxu2  ;;  %v606_v26 = vpop.f32.mrf.mxu3 }
 0x140   :  { %v562_v3 = vadd.f32 %v561_v2, %v487_v60 }
 0x142   :  { %v603_v10 = vadd.f32 %v602_v61, %v562_v3 }
 0x144   :  { %v610_v14 = vsel %vm609_vm2, %v603_v10, -inf }
 0x145   :  { %611 = vmax.xlane.f32.xlu0 %v610_v14 }
 0x147   :  { %v565_v20 = vpop.f32.mrf.mxu2 }
 0x148   :  { %v566_v25 = vadd.f32 %v565_v20, %v493_v17 }
 0x14a   :  { %v607_v27 = vadd.f32 %v606_v26, %v566_v25 }
 0x14c   :  { %v613_v33 = vsel %vm609_vm2, %v607_v27, -inf }
 0x14d   :  { %614 = vmax.xlane.f32.xlu0 %v613_v33 }
 0x1b8   :  { %v612_v18 = vpop.xlane.xlu0 %611 }
 0x1b9   :  { %v616_v21 = vsub.f32 %v603_v10, %v612_v18 }
 0x1bb   :  { %v618_v22 = vmul.f32 1.442695, %v616_v21 }
 0x1bd   :  { %642 = vpow2.f32 %v618_v22 }
 0x1c0   :  { %v615_v23 = vpop.xlane.xlu0 %614 }
 0x1c1   :  { %v617_v24 = vsub.f32 %v607_v27, %v615_v23 }
 0x1c3   :  { %v643_v28 = vpop.eup %642  ;;  %v620_v29 = vmul.f32 1.442695, %v617_v24 }
 0x1c4   :  { %v622_v30 = vsel %vm609_vm2, %v643_v28, 0.0 }
 0x1c5   :  { %644 = vpow2.f32 %v620_v29  ;;  %623 = vadd.xlane.f32.xlu1 %v622_v30 }
 0x1cb   :  { %v645_v31 = vpop.eup %644 }
 0x1cc   :  { %v625_v32 = vsel %vm609_vm2, %v645_v31, 0.0 }
 0x1cd   :  { %626 = vadd.xlane.f32.xlu1 %v625_v32 }
 0x238   :  { %v624_v38 = vpop.xlane.xlu1 %623 }
 0x239   :  { %646 = vlog2.f32 %v624_v38 }
 0x23f   :  { %v647_v39 = vpop.eup %646 }
 0x240   :  { %v629_v40 = vmul.f32 0.6931472, %v647_v39  ;;  %v627_v41 = vpop.xlane.xlu1 %626 }
 0x241   :  { %648 = vlog2.f32 %v627_v41 }
 0x242   :  { %v632_v42 = vsub.f32 %v616_v21, %v629_v40 }
 0x244   :  { %634 = vst.msk [vmem:[%s966_s5] sm:$0xff] %vm609_vm2, %v632_v42 }
 0x247   :  { %v649_v43 = vpop.eup %648 }
 0x248   :  { %v631_v44 = vmul.f32 0.6931472, %v649_v43 }
 0x24a   :  { %v633_v45 = vsub.f32 %v617_v24, %v631_v44 }
 0x24c   :  { %635 = vst.msk [vmem:[%s966_s5 + $0x8] sm:$0xff] %vm609_vm2, %v633_v45 }

</bundles_post_ra>
